<compile_context>
chip_gen: v6e
topology: v6e:2x2x1
jax: 0.10.0
libtpu: 0.0.40
codegen_flags: <defaults>
</compile_context>

<pallas_src>
import math

import jax
import jax.numpy as jnp
from jax.experimental import pallas as pl
from jax.experimental.pallas import tpu as pltpu

_LANE = 512                              # lane-dense slab width (multiple of 128)
_TARGET_BLOCK_BYTES = 2 * 1024 * 1024    # ~2 MiB per buffer


def _fixup_kernel(b2a_ref, scale_ref, b2b_ref, x_ref, o_ref):
    # Scalars live in SMEM (module params are f32); cast once to the
    # activation dtype so the elementwise chain stays in that dtype.
    dt = x_ref.dtype
    b2a = b2a_ref[0].astype(dt)
    scale = scale_ref[0].astype(dt)
    b2b = b2b_ref[0].astype(dt)
    x = x_ref[...]
    out = (x + b2a) * scale + b2b      # same op order as the PyTorch forward
    o_ref[...] = out * out + x


def mock_se_fixup_block(x, fixup_bias2a, fixup_scale, fixup_bias2b):
    """x: any-shape float array (NCHW in the module). Params: shape-(1,) f32."""
    orig_shape = x.shape
    dtype = x.dtype
    total = math.prod(orig_shape)
    itemsize = jnp.dtype(dtype).itemsize

    # Target ~2 MiB per block; row tile must be a multiple of 8 (sublane rule)
    # unless the single block covers the full row extent.
    target_rows = max(8, (_TARGET_BLOCK_BYTES // (itemsize * _LANE)) // 8 * 8)

    rows = pl.cdiv(total, _LANE)
    if rows <= target_rows:
        # One full-extent block (always layout-legal), grid of 1.
        row_tile = rows
    else:
        # Tiled path; the last block may be partial — Pallas masks the boundary.
        row_tile = target_rows

    padded_total = rows * _LANE
    flat = x.reshape(-1)
    if padded_total != total:
        # Only up to 511 pad elements; divisible totals skip this copy entirely.
        flat = jnp.pad(flat, (0, padded_total - total))
    x2d = flat.reshape(rows, _LANE)

    grid = (pl.cdiv(rows, row_tile),)

    out2d = pl.pallas_call(
        _fixup_kernel,
        out_shape=jax.ShapeDtypeStruct((rows, _LANE), dtype),
        grid_spec=pltpu.PrefetchScalarGridSpec(
            num_scalar_prefetch=0,
            grid=grid,
            in_specs=[
                pl.BlockSpec(memory_space=pltpu.SMEM),      # fixup_bias2a
                pl.BlockSpec(memory_space=pltpu.SMEM),      # fixup_scale
                pl.BlockSpec(memory_space=pltpu.SMEM),      # fixup_bias2b
                pl.BlockSpec((row_tile, _LANE), lambda i: (i, 0)),
            ],
            out_specs=pl.BlockSpec((row_tile, _LANE), lambda i: (i, 0)),
        ),
        compiler_params=pltpu.CompilerParams(
            dimension_semantics=("parallel",)),
        input_output_aliases={3: 0},   # reuse x's HBM allocation for the output
    )(fixup_bias2a, fixup_scale, fixup_bias2b, x2d)

    out_flat = out2d.reshape(-1)
    if padded_total != total:
        out_flat = out_flat[:total]
    return out_flat.reshape(orig_shape)


def _ref(x, a, s, b):
    out = (x + a[0]) * s[0] + b[0]
    return out * out + x


if __name__ == "__main__":
    # Deterministic parameter init matching the module's __init__:
    #   fixup_bias2a = zeros(1), fixup_scale = ones(1), fixup_bias2b = zeros(1)
    fixup_bias2a = jnp.zeros((1,), jnp.float32)
    fixup_scale = jnp.ones((1,), jnp.float32)
    fixup_bias2b = jnp.zeros((1,), jnp.float32)

    # Small NCHW input consistent with the forward pass (single-block path).
    key = jax.random.PRNGKey(0)
    x = jax.random.normal(key, (2, 4, 16, 16), dtype=jnp.float32)
    out = jax.block_until_ready(
        mock_se_fixup_block(x, fixup_bias2a, fixup_scale, fixup_bias2b))
    assert out.shape == x.shape and out.dtype == x.dtype
    assert jnp.allclose(out, _ref(x, fixup_bias2a, fixup_scale, fixup_bias2b),
                        atol=1e-6, rtol=1e-6)

    # Larger input with non-trivial params: exercises the tiled path with a
    # partial last block (1568 rows, tile 1024) and in-place aliasing.
    kx, ka, ks, kb = jax.random.split(jax.random.PRNGKey(0), 4)
    x_big = jax.random.normal(kx, (4, 64, 56, 56), dtype=jnp.float32)
    a_big = jax.random.normal(ka, (1,), jnp.float32) * 0.1
    s_big = 1.0 + jax.random.normal(ks, (1,), jnp.float32) * 0.1
    b_big = jax.random.normal(kb, (1,), jnp.float32) * 0.1
    out_big = jax.block_until_ready(
        mock_se_fixup_block(x_big, a_big, s_big, b_big))
    assert jnp.allclose(out_big, _ref(x_big, a_big, s_big, b_big),
                        atol=1e-6, rtol=1e-6)

    # Odd total (not divisible by 512): exercises the minimal-pad path.
    x_odd = jax.random.normal(jax.random.PRNGKey(0), (3, 5, 7, 11),
                              dtype=jnp.float32)
    out_odd = jax.block_until_ready(
        mock_se_fixup_block(x_odd, fixup_bias2a, fixup_scale, fixup_bias2b))
    assert jnp.allclose(out_odd, _ref(x_odd, fixup_bias2a, fixup_scale,
                                      fixup_bias2b), atol=1e-6, rtol=1e-6)

    print("KERNEL_OK")
</pallas_src>

<mosaic_0001>
module attributes {stable_mosaic.version = 11 : i64} {
  func.func @_fixup_kernel(%arg0: i32, %arg1: memref<1xf32, #tpu.memory_space<smem>>, %arg2: memref<1xf32, #tpu.memory_space<smem>>, %arg3: memref<1xf32, #tpu.memory_space<smem>>, %arg4: memref<4x512xf32, #tpu.memory_space<vmem>>, %arg5: memref<4x512xf32, #tpu.memory_space<vmem>>) attributes {dimension_semantics = [#tpu.dimension_semantics<parallel>], iteration_bounds = array<i64: 1>, scalar_prefetch = 0 : i64, scratch_operands = 0 : i64, tpu.core_type = #tpu.core_type<tc>, window_params = [{transform_indices = @transform_0, window_bounds = array<i64: 1>}, {transform_indices = @transform_1, window_bounds = array<i64: 1>}, {transform_indices = @transform_2, window_bounds = array<i64: 1>}, {transform_indices = @transform_3, window_bounds = array<i64: 4, 512>}, {transform_indices = @transform_4, window_bounds = array<i64: 4, 512>}]} {
    %c0 = arith.constant 0 : index
    %0 = memref.load %arg1[%c0] : memref<1xf32, #tpu.memory_space<smem>>
    %c0_0 = arith.constant 0 : index
    %1 = memref.load %arg2[%c0_0] : memref<1xf32, #tpu.memory_space<smem>>
    %c0_1 = arith.constant 0 : index
    %2 = memref.load %arg3[%c0_1] : memref<1xf32, #tpu.memory_space<smem>>
    %c0_2 = arith.constant 0 : index
    %c0_3 = arith.constant 0 : index
    %3 = vector.load %arg4[%c0_2, %c0_3] : memref<4x512xf32, #tpu.memory_space<vmem>>, vector<4x512xf32>
    %4 = vector.broadcast %0 : f32 to vector<4x512xf32>
    %5 = arith.addf %3, %4 : vector<4x512xf32>
    %6 = vector.broadcast %1 : f32 to vector<4x512xf32>
    %7 = arith.mulf %5, %6 : vector<4x512xf32>
    %8 = vector.broadcast %2 : f32 to vector<4x512xf32>
    %9 = arith.addf %7, %8 : vector<4x512xf32>
    %10 = arith.mulf %9, %9 : vector<4x512xf32>
    %11 = arith.addf %10, %3 : vector<4x512xf32>
    %c0_4 = arith.constant 0 : index
    %c0_5 = arith.constant 0 : index
    %12 = vector.load %arg5[%c0_4, %c0_5] : memref<4x512xf32, #tpu.memory_space<vmem>>, vector<4x512xf32>
    tpu.vector_store %arg5[%c0_4, %c0_5], %11 {strides = array<i32>} : memref<4x512xf32, #tpu.memory_space<vmem>>, vector<4x512xf32>,
    return
  }
  func.func @transform_0(%arg0: i32) -> i32 {
    %c0_i32 = arith.constant 0 : i32
    %c0_i32_0 = arith.constant 0 : i32
    return %c0_i32 : i32
  }
  func.func @transform_1(%arg0: i32) -> i32 {
    %c0_i32 = arith.constant 0 : i32
    %c0_i32_0 = arith.constant 0 : i32
    return %c0_i32 : i32
  }
  func.func @transform_2(%arg0: i32) -> i32 {
    %c0_i32 = arith.constant 0 : i32
    %c0_i32_0 = arith.constant 0 : i32
    return %c0_i32 : i32
  }
  func.func @transform_3(%arg0: i32) -> (i32, i32) {
    %c0_i32 = arith.constant 0 : i32
    %c0_i32_0 = arith.constant 0 : i32
    return %arg0, %c0_i32 : i32, i32
  }
  func.func @transform_4(%arg0: i32) -> (i32, i32) {
    %c0_i32 = arith.constant 0 : i32
    %c0_i32_0 = arith.constant 0 : i32
    return %arg0, %c0_i32 : i32, i32
  }
}

</mosaic_0001>

<bundles_post_ra>
// kernel: tpu_custom_call.1
= control target key start
LH: loop header
LB: loop body
LE: loop exit
PB: predicated region body
PF: predicated region fallthrough
CT: control target
= control target key end

     0   :  { %12 = vsyncpa [#allocation6], 0  ;;  %s156_s0 = inlined_call_operand.<no memory space> [shape: f32[1], index: 0, kind: input, shape index: {}]   ;;  %s157_s1 = inlined_call_operand.<no memory space> [shape: f32[1], index: 1, kind: input, shape index: {}]   ;;  %s158_s2 = inlined_call_operand.<no memory space> [shape: f32[1], index: 2, kind: input, shape index: {}]   ;;  %s159_s3 = inlined_call_operand.hbm [shape: f32[4,512], index: 3, kind: input, shape index: {}, may-alias: {3,4}]   ;;  %s160_s4 = inlined_call_operand.hbm [shape: f32[4,512], index: 4, kind: output, shape index: {}, may-alias: {3,4}]  }
   0x1   :  { %13 = vsyncpa [#allocation7], 0  ;;  %s114_s15 = smov [#allocation5]  }
   0x2   :  { %s26_s16 = sshll.u32 %s114_s15, 4  ;;  %s27_s16 = int_to_ptr.vmem [resolvable:$true] %s26_s16 }
   0x3   :  { %s78_s17 = scalar_lea.vmem %s27_s16, 256  ;;  %p83_p1 = scmp.lt.s32.totalorder %s27_s16, %s27_s16 }
   0x4   :  { %p79_p0 = scmp.ne.s32.totalorder %s27_s16, %s78_s17  ;;  %p84_p2 = scmp.lt.s32.totalorder %s78_s17, %s78_s17 }
   0x6   :  { %p85_p3 = por %p84_p2, %p83_p1 }
   0x8   :  { %p86_p4 = pnand %p85_p3, %p79_p0 }
   0xa   :  { %89 = shalt.err (!%p86_p4)
}
   0xb   :  { %29 = dma.hbm_to_vmem [thread:$0]  %s159_s3, 256, %s27_s16, [#allocation6]  }
   0xc   :  { %110 = dma.done.wait [#allocation6], 256  }
   0xd   :  { %111 = vsyncadd [#allocation6], 4294967040  ;;  %v38_v0 = vstv %s156_s0  ;;  %v36_v1 = vld [vmem:[#allocation5] sm:$0xff]  ;;  %v41_v2 = vstv %s157_s1  ;;  %v37_v3 = vld [vmem:[#allocation5 + $0x8] sm:$0xff]  ;;  %v44_v6 = vstv %s158_s2  ;;  %s115_s3 = smov [#allocation8]  }
   0xe   :  { %v39_v4 = vadd.f32 %v38_v0, %v36_v1  ;;  %v40_v5 = vadd.f32 %v38_v0, %v37_v3  ;;  %s59_s26 = sshll.u32 %s115_s3, 4  ;;  %s60_s26 = int_to_ptr.vmem [resolvable:$true] %s59_s26 }
   0xf   :  { %s90_s0 = scalar_lea.vmem %s60_s26, 256  ;;  %p95_p6 = scmp.lt.s32.totalorder %s60_s26, %s60_s26 }
  0x10   :  { %v42_v7 = vmul.f32 %v41_v2, %v39_v4  ;;  %v43_v8 = vmul.f32 %v41_v2, %v40_v5  ;;  %p91_p5 = scmp.ne.s32.totalorder %s60_s26, %s90_s0  ;;  %p96_p7 = scmp.lt.s32.totalorder %s90_s0, %s90_s0 }
  0x12   :  { %v45_v9 = vadd.f32 %v44_v6, %v42_v7  ;;  %v46_v10 = vadd.f32 %v44_v6, %v43_v8  ;;  %p97_p8 = por %p96_p7, %p95_p6 }
  0x14   :  { %v47_v11 = vmul.f32 %v45_v9, %v45_v9  ;;  %v48_v12 = vmul.f32 %v46_v10, %v46_v10  ;;  %p98_p9 = pnand %p97_p8, %p91_p5 }
  0x16   :  { %v49_v13 = vadd.f32 %v47_v11, %v36_v1  ;;  %v50_v14 = vadd.f32 %v48_v12, %v37_v3 }
  0x18   :  { %51 = vst [vmem:[#allocation8] sm:$0xff] %v49_v13  ;;  %52 = vst [vmem:[#allocation8 + $0x8] sm:$0xff] %v50_v14 }
  0x19   :  { %101 = shalt.err (!%p98_p9)
}
  0x1a   :  { %62 = dma.vmem_to_hbm [thread:$0]  %s60_s26, 256, %s160_s4, [#allocation7]  }
  0x1b   :  { %112 = dma.done.wait [#allocation7], 256  }
  0x1c   :  { %113 = vsyncadd [#allocation7], 4294967040 }
  0x1d   :  { %66 = vsyncpa [#allocation6], 1 }
  0x1e   :  { %67 = vsyncpa [#allocation7], 1 }

</bundles_post_ra>
